<compile_context>
chip_gen: v7x
topology: tpu7x:2x2x1
jax: 0.10.0
libtpu: 0.0.40
codegen_flags: <defaults>
</compile_context>

<pallas_src>
import jax
import jax.numpy as jnp
from jax import lax
from jax.experimental import pallas as pl
from jax.experimental.pallas import tpu as pltpu

EPS = 1e-6


def silumod_kernel(x_ref, g_ref, w_ref, b_ref, o_ref):
    # x_ref: (Rb, HW)   g_ref: (Rb, Rb)   w_ref/b_ref: (Rb, 1)   o_ref: (Rb, HW)
    x = x_ref[...]
    xf = x.astype(jnp.float32)  # no-op for f32 inputs; keeps stats accurate for bf16

    # AdaptiveAvgPool2d(1): per-(batch, channel) mean over all spatial positions (lane reduce).
    pooled = jnp.mean(xf, axis=-1, keepdims=True)                      # (Rb, 1)

    # LayerNorm over the channel axis of each batch (groups of C consecutive rows), eps=1e-6,
    # biased variance.  G averages within each group of C rows (two tiny MXU matmuls).
    g = g_ref[...]
    mu = jnp.dot(g, pooled, preferred_element_type=jnp.float32)        # (Rb, 1)
    d = pooled - mu
    var = jnp.dot(g, d * d, preferred_element_type=jnp.float32)        # (Rb, 1)
    shift = d * lax.rsqrt(var + EPS) * w_ref[...] + b_ref[...]         # (Rb, 1)

    # compute(x, shift) = sigmoid(shift + x) * x, shift broadcast over lanes.
    # Reciprocal on the EUP (approx vrcp) keeps the VALU slot free.
    z = shift + xf
    out = xf * pl.reciprocal(1.0 + jnp.exp(-z), approx=True)
    o_ref[...] = out.astype(o_ref.dtype)


def _pick_batches_per_block(n, c, hw, itemsize, target_bytes=4 << 20, max_rows=512):
    """Choose how many whole batches each grid step processes.

    Targets ~target_bytes per x block (so 2 in + 2 out double-buffers stay well under the VMEM
    limit), caps rows so the (Rb, Rb) group matrix stays small, keeps Rb a multiple of 8 (full
    sublanes) unless the block is the whole array, and prefers >= 2 grid steps for megacore
    sharding when possible.
    """
    per_batch = c * hw * itemsize
    cap = min(n, max(1, target_bytes // per_batch), max(1, max_rows // c))

    def ok(nb):
        rows = nb * c
        return n % nb == 0 and (rows % 8 == 0 or nb == n)

    nb = n  # fallback: whole problem as a single block (always shape-legal)
    for cand in range(cap, 0, -1):
        if ok(cand):
            nb = cand
            break
    # Prefer >= 2 grid steps (v7x has 2 TensorCores) while keeping full 8-row sublane tiles.
    if n // nb < 2:
        for cand in range(nb - 1, 0, -1):
            if n % cand == 0 and (cand * c) % 8 == 0 and n // cand >= 2:
                nb = cand
                break
    return nb


def silumod_forward(x, weight, bias):
    """x: (N, C, H, W); weight/bias: (C,) LayerNorm affine params."""
    N, C, H, W = x.shape
    HW = H * W
    R = N * C
    itemsize = jnp.dtype(x.dtype).itemsize

    # TODO(synk): if a single batch's (C, HW) slab no longer fits double-buffered in VMEM
    # (C*HW*itemsize >> 8 MiB), switch to a two-level grid: inner HW tiles feeding a pooled-sum
    # accumulator on an "arbitrary" reduction axis, then a second elementwise pass.
    nb = _pick_batches_per_block(N, C, HW, itemsize)
    Rb = nb * C

    xf = x.reshape(R, HW)
    w_rows = jnp.tile(weight.astype(jnp.float32).reshape(1, C), (nb, 1)).reshape(Rb, 1)
    b_rows = jnp.tile(bias.astype(jnp.float32).reshape(1, C), (nb, 1)).reshape(Rb, 1)
    grp = jnp.arange(Rb) // C
    g = (grp[:, None] == grp[None, :]).astype(jnp.float32) / float(C)   # (Rb, Rb)

    out = pl.pallas_call(
        silumod_kernel,
        out_shape=jax.ShapeDtypeStruct((R, HW), x.dtype),
        grid=(R // Rb,),
        in_specs=[
            pl.BlockSpec((Rb, HW), lambda i: (i, 0)),
            # Constant block indices below -> DMA'd once, resident across the whole grid.
            pl.BlockSpec((Rb, Rb), lambda i: (0, 0)),
            pl.BlockSpec((Rb, 1), lambda i: (0, 0)),
            pl.BlockSpec((Rb, 1), lambda i: (0, 0)),
        ],
        out_specs=pl.BlockSpec((Rb, HW), lambda i: (i, 0)),
        compiler_params=pltpu.CompilerParams(
            dimension_semantics=("parallel",),
            vmem_limit_bytes=32 * 1024 * 1024,
        ),
    )(xf, g, w_rows, b_rows)
    return out.reshape(N, C, H, W)


def silumod_reference(x, weight, bias):
    """Pure-JAX reference mirroring the PyTorch module."""
    pooled = jnp.mean(x, axis=(2, 3))  # (N, C): AdaptiveAvgPool2d(1).squeeze()
    mu = jnp.mean(pooled, axis=-1, keepdims=True)
    var = jnp.mean((pooled - mu) ** 2, axis=-1, keepdims=True)
    norm = (pooled - mu) / jnp.sqrt(var + EPS)
    shift = norm * weight[None, :] + bias[None, :]  # (N, C)
    shift = shift[:, :, None, None]
    return jax.nn.sigmoid(shift + x) * x


if __name__ == "__main__":
    key = jax.random.PRNGKey(0)
    N, C, H, W = 2, 4, 16, 16

    x = jax.random.normal(key, (N, C, H, W), dtype=jnp.float32)

    # nn.LayerNorm(planes) with weight init'd to 0.01 and bias to 0.0 (per __init__).
    weight = jnp.full((C,), 0.01, dtype=jnp.float32)
    bias = jnp.zeros((C,), dtype=jnp.float32)

    out = silumod_forward(x, weight, bias)
    out = jax.block_until_ready(out)

    ref = silumod_reference(x, weight, bias)
    assert out.shape == (N, C, H, W)
    # Tolerance covers the EUP approximate reciprocal in the sigmoid (well under 5e-3 relative);
    # switch approx=False in the kernel if exact 1e-5 agreement is ever required.
    assert jnp.allclose(out, ref, atol=5e-3, rtol=5e-3), "mismatch vs reference"

    print("KERNEL_OK")
</pallas_src>

<mosaic_0001>
module attributes {stable_mosaic.version = 11 : i64} {
  func.func @silumod_kernel(%arg0: i32, %arg1: memref<8x256xf32, #tpu.memory_space<vmem>>, %arg2: memref<8x8xf32, #tpu.memory_space<vmem>>, %arg3: memref<8x1xf32, #tpu.memory_space<vmem>>, %arg4: memref<8x1xf32, #tpu.memory_space<vmem>>, %arg5: memref<8x256xf32, #tpu.memory_space<vmem>>) attributes {dimension_semantics = [#tpu.dimension_semantics<parallel>], iteration_bounds = array<i64: 1>, scalar_prefetch = 0 : i64, scratch_operands = 0 : i64, tpu.core_type = #tpu.core_type<tc>, window_params = [{transform_indices = @transform_0, window_bounds = array<i64: 8, 256>}, {pipeline_mode = #tpu.pipeline_mode<synchronous>, transform_indices = @transform_1, window_bounds = array<i64: 8, 8>}, {pipeline_mode = #tpu.pipeline_mode<synchronous>, transform_indices = @transform_2, window_bounds = array<i64: 8, 1>}, {pipeline_mode = #tpu.pipeline_mode<synchronous>, transform_indices = @transform_3, window_bounds = array<i64: 8, 1>}, {transform_indices = @transform_4, window_bounds = array<i64: 8, 256>}]} {
    %c0 = arith.constant 0 : index
    %c0_0 = arith.constant 0 : index
    %0 = vector.load %arg1[%c0, %c0_0] : memref<8x256xf32, #tpu.memory_space<vmem>>, vector<8x256xf32>
    %cst = arith.constant dense<0.000000e+00> : vector<8xf32>
    %1 = vector.multi_reduction <add>, %0, %cst [1] : vector<8x256xf32> to vector<8xf32>
    %2 = vector.shape_cast %1 : vector<8xf32> to vector<8x1xf32>
    %cst_1 = arith.constant 2.560000e+02 : f32
    %3 = vector.broadcast %cst_1 : f32 to vector<8x1xf32>
    %4 = arith.divf %2, %3 : vector<8x1xf32>
    %c0_2 = arith.constant 0 : index
    %c0_3 = arith.constant 0 : index
    %5 = vector.load %arg2[%c0_2, %c0_3] : memref<8x8xf32, #tpu.memory_space<vmem>>, vector<8x8xf32>
    %cst_4 = arith.constant dense<0.000000e+00> : vector<8x1xf32>
    %6 = tpu.matmul %5, %4, %cst_4 {dimension_numbers = #tpu.dot_dimension_numbers<[1], [0], [0], [1], [0, 0, 1, 1], [], []>} : vector<8x8xf32>, vector<8x1xf32>, vector<8x1xf32> -> vector<8x1xf32>
    %7 = arith.subf %4, %6 : vector<8x1xf32>
    %8 = arith.mulf %7, %7 : vector<8x1xf32>
    %cst_5 = arith.constant dense<0.000000e+00> : vector<8x1xf32>
    %9 = tpu.matmul %5, %8, %cst_5 {dimension_numbers = #tpu.dot_dimension_numbers<[1], [0], [0], [1], [0, 0, 1, 1], [], []>} : vector<8x8xf32>, vector<8x1xf32>, vector<8x1xf32> -> vector<8x1xf32>
    %cst_6 = arith.constant 9.99999997E-7 : f32
    %10 = vector.broadcast %cst_6 : f32 to vector<8x1xf32>
    %11 = arith.addf %9, %10 : vector<8x1xf32>
    %12 = math.rsqrt %11 : vector<8x1xf32>
    %13 = arith.mulf %7, %12 : vector<8x1xf32>
    %c0_7 = arith.constant 0 : index
    %c0_8 = arith.constant 0 : index
    %14 = vector.load %arg3[%c0_7, %c0_8] : memref<8x1xf32, #tpu.memory_space<vmem>>, vector<8x1xf32>
    %15 = arith.mulf %13, %14 : vector<8x1xf32>
    %c0_9 = arith.constant 0 : index
    %c0_10 = arith.constant 0 : index
    %16 = vector.load %arg4[%c0_9, %c0_10] : memref<8x1xf32, #tpu.memory_space<vmem>>, vector<8x1xf32>
    %17 = arith.addf %15, %16 : vector<8x1xf32>
    %18 = vector.broadcast %17 : vector<8x1xf32> to vector<8x256xf32>
    %19 = arith.addf %18, %0 : vector<8x256xf32>
    %cst_11 = arith.constant 0.000000e+00 : f32
    %20 = vector.broadcast %cst_11 : f32 to vector<8x256xf32>
    %21 = arith.subf %20, %19 : vector<8x256xf32>
    %22 = math.exp %21 : vector<8x256xf32>
    %cst_12 = arith.constant 1.000000e+00 : f32
    %23 = vector.broadcast %cst_12 : f32 to vector<8x256xf32>
    %24 = arith.addf %23, %22 : vector<8x256xf32>
    %25 = tpu.reciprocal %24 {approx = true} : vector<8x256xf32> -> vector<8x256xf32>
    %26 = arith.mulf %0, %25 : vector<8x256xf32>
    %c0_13 = arith.constant 0 : index
    %c0_14 = arith.constant 0 : index
    %27 = vector.load %arg5[%c0_13, %c0_14] : memref<8x256xf32, #tpu.memory_space<vmem>>, vector<8x256xf32>
    tpu.vector_store %arg5[%c0_13, %c0_14], %26 {strides = array<i32>} : memref<8x256xf32, #tpu.memory_space<vmem>>, vector<8x256xf32>,
    return
  }
  func.func @transform_0(%arg0: i32) -> (i32, i32) {
    %c0_i32 = arith.constant 0 : i32
    %c0_i32_0 = arith.constant 0 : i32
    return %arg0, %c0_i32 : i32, i32
  }
  func.func @transform_1(%arg0: i32) -> (i32, i32) {
    %c0_i32 = arith.constant 0 : i32
    %c0_i32_0 = arith.constant 0 : i32
    %c0_i32_1 = arith.constant 0 : i32
    return %c0_i32, %c0_i32_0 : i32, i32
  }
  func.func @transform_2(%arg0: i32) -> (i32, i32) {
    %c0_i32 = arith.constant 0 : i32
    %c0_i32_0 = arith.constant 0 : i32
    %c0_i32_1 = arith.constant 0 : i32
    return %c0_i32, %c0_i32_0 : i32, i32
  }
  func.func @transform_3(%arg0: i32) -> (i32, i32) {
    %c0_i32 = arith.constant 0 : i32
    %c0_i32_0 = arith.constant 0 : i32
    %c0_i32_1 = arith.constant 0 : i32
    return %c0_i32, %c0_i32_0 : i32, i32
  }
  func.func @transform_4(%arg0: i32) -> (i32, i32) {
    %c0_i32 = arith.constant 0 : i32
    %c0_i32_0 = arith.constant 0 : i32
    return %arg0, %c0_i32 : i32, i32
  }
}

</mosaic_0001>

<bundles_post_ra>
// kernel: tpu_custom_call.1
= control target key start
LH: loop header
LB: loop body
LE: loop exit
PB: predicated region body
PF: predicated region fallthrough
CT: control target
= control target key end

     0   :  { %9 = vsyncpa [#allocation3], 0  ;;  %s372_s0 = inlined_call_operand.vmem [shape: f32[8,256], index: 0, kind: input, shape index: {}]   ;;  %s373_s1 = inlined_call_operand.hbm [shape: f32[8,8], index: 1, kind: input, shape index: {}]   ;;  %s374_s2 = inlined_call_operand.vmem [shape: f32[8,1], index: 2, kind: input, shape index: {}]   ;;  %s375_s3 = inlined_call_operand.vmem [shape: f32[8,1], index: 3, kind: input, shape index: {}]   ;;  %s376_s4 = inlined_call_operand.hbm [shape: f32[8,256], index: 4, kind: output, shape index: {}]  }
   0x1   :  { %10 = vsyncpa [#allocation4], 0  ;;  %s306_s15 = smov [#allocation2]   ;;  %s258_s19 = scalar_lea.hbm %s373_s1, 128 }
   0x2   :  { %s19_s16 = sshll.u32 %s306_s15, 4  ;;  %p259_p0 = scmp.ne.s32.totalorder %s373_s1, %s258_s19  ;;  %s20_s16 = int_to_ptr.vmem [resolvable:$true] %s19_s16 }
   0x3   :  { %p262_p1 = scmp.lt.u32.totalorder %s258_s19, %s373_s1 }
   0x5   :  { %p264_p2 = pnand %p262_p1, %p259_p0 }
   0x7   :  { %267 = shalt.err (!%p264_p2)
}
   0x8   :  { %s268_s24 = scalar_lea.vmem %s20_s16, 128  ;;  %p273_p4 = scmp.lt.s32.totalorder %s20_s16, %s20_s16 }
   0x9   :  { %p269_p3 = scmp.ne.s32.totalorder %s20_s16, %s268_s24  ;;  %p274_p5 = scmp.lt.s32.totalorder %s268_s24, %s268_s24 }
   0xb   :  { %p275_p6 = por %p274_p5, %p273_p4 }
   0xd   :  { %p276_p7 = pnand %p275_p6, %p269_p3 }
   0xf   :  { %279 = shalt.err (!%p276_p7)
}
  0x10   :  { %22 = dma.hbm_to_vmem [thread:$0]  %s373_s1, 128, %s20_s16, [#allocation3]  }
  0x11   :  { %302 = dma.done.wait [#allocation3], 128  }
  0x12   :  { %303 = vsyncadd [#allocation3], 4294967168  ;;  %v30_v0 = vld [vmem:[%s372_s0] sm:$0xff]  ;;  %v31_v1 = vld [vmem:[%s372_s0 + $0x8] sm:$0xff]  ;;  %v307_v3 = vmov 0.0   ;;  %vm308_vm0 = vmmov 0  }
  0x13   :  { %v32_v2 = vadd.f32 %v31_v1, %v30_v0  ;;  %232 = vmatprep.subr.mxu0 %v307_v3  ;;  %237 = vmatprep.subr.mxu1 %v307_v3  ;;  %v37_v6 = vld [vmem:[#allocation2] sm:$0xff]  ;;  %vm38_vm1 = vcmask 64512   ;;  %v309_v11 = vmov 0  }
  0x14   :  { %234 = vmatprep.mubr.msk.f32.mxu0 %vm308_vm0, %v307_v3  ;;  %239 = vmatprep.mubr.msk.f32.mxu1 %vm308_vm0, %v307_v3  ;;  %v186_v16 = vld [vmem:[%s374_s2] sm:$0xff]  ;;  %s310_s2 = smov [#allocation5]  }
  0x15   :  { %33 = vadd.xlane.f32.xlu0 %v32_v2  ;;  %v188_v18 = vld [vmem:[%s375_s3] sm:$0xff]  ;;  %s217_s3 = sshll.u32 %s310_s2, 4  ;;  %s218_s3 = int_to_ptr.vmem [resolvable:$true] %s217_s3 }
  0x16   :  { %247 = vset.pattern.permute.xlu0 %v309_v11  ;;  %s280_s7 = scalar_lea.vmem %s218_s3, 256  ;;  %p285_p9 = scmp.lt.s32.totalorder %s218_s3, %s218_s3 }
  0x17   :  { %p281_p8 = scmp.ne.s32.totalorder %s218_s3, %s280_s7  ;;  %p286_p10 = scmp.lt.s32.totalorder %s280_s7, %s280_s7 }
  0x19   :  { %p287_p11 = por %p286_p10, %p285_p9 }
  0x1b   :  { %p288_p12 = pnand %p287_p11, %p281_p8 }
  0xa2   :  { %v34_v4 = vpop.xlane.xlu0 %33 }
  0xa3   :  { %v36_v5 = vmul.f32 0.00390625, %v34_v4 }
  0xa5   :  { %233 = vmatpush3.msra.mxu0 %v36_v5 }
  0xa6   :  { %235 = vmatmul.mubr.msk.f32.vlgmr.msra.gmra.mrb[0].mxu0 %vm38_vm1, %v37_v6 }
 0x179   :  { %v108_v7 = vpop.f32.mrb[0].mxu0 }
 0x17a   :  { %v112_v8 = vsub.f32 %v36_v5, %v108_v7  ;;  %v236_v9 = vpop.f32.mrb[1].mxu0 }
 0x17c   :  { %v113_v10 = vmul.f32 %v112_v8, %v112_v8 }
 0x17e   :  { %238 = vmatpush3.msra.mxu1 %v113_v10 }
 0x17f   :  { %240 = vmatmul.mubr.msk.f32.vlgmr.msra.gmra.mrb[0].mxu1 %vm38_vm1, %v37_v6 }
 0x252   :  { %v180_v12 = vpop.f32.mrb[0].mxu1 }
 0x253   :  { %v181_v13 = vadd.f32 1e-06, %v180_v12  ;;  %v241_v14 = vpop.f32.mrb[1].mxu1 }
 0x255   :  { %248 = vrsqrt.f32 %v181_v13 }
 0x25f   :  { %v249_v15 = vpop.eup %248 }
 0x260   :  { %v185_v17 = vmul.f32 %v249_v15, %v112_v8 }
 0x262   :  { %v187_v19 = vmul.f32 %v186_v16, %v185_v17 }
 0x264   :  { %v189_v20 = vadd.f32 %v188_v18, %v187_v19 }
 0x266   :  { %192 = vperm.xlu0 %247, %v189_v20  }
 0x2e5   :  { %v193_v21 = vpop.permute.xlu0 %192 }
 0x2e6   :  { %v195_v22 = vadd.f32 %v193_v21, %v30_v0  ;;  %v196_v23 = vadd.f32 %v193_v21, %v31_v1 }
 0x2e8   :  { %v197_v24 = vsub.f32 0.0, %v195_v22  ;;  %v198_v25 = vsub.f32 0.0, %v196_v23 }
 0x2ea   :  { %v199_v26 = vmul.f32 1.442695, %v197_v24  ;;  %v201_v27 = vmul.f32 1.442695, %v198_v25 }
 0x2ec   :  { %250 = vpow2.f32 %v199_v26 }
 0x2ed   :  { %252 = vpow2.f32 %v201_v27 }
 0x2f6   :  { %v251_v28 = vpop.eup %250 }
 0x2f7   :  { %v253_v29 = vpop.eup %252  ;;  %v203_v30 = vadd.f32 1.0, %v251_v28 }
 0x2f8   :  { %v204_v31 = vadd.f32 1.0, %v253_v29 }
 0x2f9   :  { %254 = vrcp.f32 %v203_v30 }
 0x2fa   :  { %256 = vrcp.f32 %v204_v31 }
 0x303   :  { %v255_v32 = vpop.eup %254 }
 0x304   :  { %v257_v33 = vpop.eup %256  ;;  %v207_v34 = vmul.f32 %v255_v32, %v30_v0 }
 0x305   :  { %v208_v35 = vmul.f32 %v257_v33, %v31_v1 }
 0x306   :  { %209 = vst [vmem:[#allocation5] sm:$0xff] %v207_v34 }
 0x307   :  { %210 = vst [vmem:[#allocation5 + $0x8] sm:$0xff] %v208_v35 }
 0x308   :  { %291 = shalt.err (!%p288_p12)
}
 0x309   :  { %s292_s10 = scalar_lea.hbm %s376_s4, 256 }
 0x30a   :  { %p293_p13 = scmp.ne.s32.totalorder %s376_s4, %s292_s10  ;;  %p296_p0 = scmp.lt.u32.totalorder %s292_s10, %s376_s4 }
 0x30c   :  { %p298_p1 = pnand %p296_p0, %p293_p13 }
 0x30e   :  { %301 = shalt.err (!%p298_p1)
}
 0x30f   :  { %220 = dma.vmem_to_hbm [thread:$0]  %s218_s3, 256, %s376_s4, [#allocation4]  }
 0x310   :  { %304 = dma.done.wait [#allocation4], 256  }
 0x311   :  { %305 = vsyncadd [#allocation4], 4294967040 }
 0x312   :  { %224 = vsyncpa [#allocation3], 1 }
 0x313   :  { %225 = vsyncpa [#allocation4], 1 }

</bundles_post_ra>
